<compile_context>
chip_gen: v7x
topology: tpu7x:2x2x1
jax: 0.10.0
libtpu: 0.0.40
codegen_flags: <defaults>
</compile_context>

<pallas_src>
import functools

import jax
import jax.numpy as jnp
from jax.experimental import pallas as pl
from jax.experimental.pallas import tpu as pltpu


# ----------------------------------------------------------------------------
# Kernel: one (tm, tn) output tile, K reduced over grid axis 2.
# ----------------------------------------------------------------------------
def _conv1d_kernel(x_ref, w_ref, b_ref, o_ref, acc_ref, *, precision):
    k = pl.program_id(2)

    @pl.when(k == 0)
    def _():
        acc_ref[...] = jnp.zeros_like(acc_ref)

    # weight layout is (K, N): contraction on x's last dim / w's first dim,
    # feeds the MXU directly with no transpose.
    acc_ref[...] += jnp.dot(x_ref[...], w_ref[...],
                            preferred_element_type=jnp.float32,
                            precision=precision)

    @pl.when(k == pl.num_programs(2) - 1)
    def _():
        o_ref[...] = (acc_ref[...] + b_ref[...].astype(jnp.float32)
                      ).astype(o_ref.dtype)


# ----------------------------------------------------------------------------
# Tiling helpers
# ----------------------------------------------------------------------------
def _round_up(v, m):
    return ((v + m - 1) // m) * m


def _vmem_capacity_bytes():
    """Physical VMEM of the current chip; conservative (v7x) fallback."""
    try:
        return int(pltpu.get_tpu_info().vmem_capacity_bytes)
    except Exception:
        return 64 << 20


def _footprint_bytes(tm, tn, tk, in_itemsize, out_itemsize):
    # double-buffered x / w / bias / out tiles + single f32 accumulator
    dbuf = 2 * (tm * tk * in_itemsize      # x tile
                + tk * tn * in_itemsize    # w tile
                + tn * 4                   # bias row
                + tm * tn * out_itemsize)  # output tile
    return dbuf + tm * tn * 4              # f32 accumulator (scratch, 1 copy)


def _pick_tile(dim, cap, align, min_align):
    """Tile <= cap.  dim <= cap: single (min_align-rounded) tile.  Otherwise
    prefer an aligned divisor of dim in [cap/2, cap] (zero padding); else
    return the cap and let the caller pad dim up to a multiple of it."""
    cap = max(align, (cap // align) * align)
    if dim <= cap:
        return _round_up(dim, min_align)
    lo = max(align, (cap // 2 // align) * align)
    t = cap
    while t >= lo:
        if dim % t == 0:
            return t
        t -= align
    return cap


def _select_tiles(m, nx, nf, in_itemsize, out_itemsize, vmem_budget,
                  tm_cap, tn_cap, tk_cap):
    # --- initial pick --------------------------------------------------
    if m >= 256:
        tm = _pick_tile(m, tm_cap, 256, 8)      # MXU-friendly 256 alignment
    else:
        tm = _round_up(m, 8)                    # small-M (decode): one M tile
    tk = _pick_tile(nx, tk_cap, 128, 128)
    tn = _pick_tile(nf, tn_cap, 128, 128)       # lane-dense output

    # --- shrink until the double-buffered footprint fits VMEM budget ----
    while _footprint_bytes(tm, tn, tk, in_itemsize, out_itemsize) > vmem_budget:
        if tk > 128 and tk >= tn and tk >= tm:
            tk = max(128, (tk // 2 // 128) * 128)
        elif tn > 128 and tn >= tm:
            tn = max(128, (tn // 2 // 128) * 128)
        elif tm > 8:
            tm = max(8, _round_up(tm // 2, 8))
        else:
            break  # already at minimum tiles

    # --- megacore occupancy: >= 2 (i, j) blocks when possible -----------
    def n_parallel_blocks():
        return (_round_up(m, tm) // tm) * (_round_up(nf, tn) // tn)

    while n_parallel_blocks() < 2:
        if tn >= 256:
            tn = max(128, (tn // 2 // 128) * 128)
        elif tm >= 16:
            tm = max(8, _round_up(tm // 2, 8))
        else:
            break
    return tm, tn, tk


# ----------------------------------------------------------------------------
# Wrapper: y = x @ weight + bias, weight of shape (nx, nf) (Conv1D layout).
# ----------------------------------------------------------------------------
def conv1d(x, weight, bias, *, tm_cap=512, tn_cap=1024, tk_cap=1024,
           compute_dtype=None, precision=None):
    *lead, nx = x.shape
    assert weight.shape[0] == nx
    nf = weight.shape[1]
    assert bias.shape == (nf,)

    # Optional operand cast (e.g. bf16 for MXU peak on v5e/v6e/v7x).
    if compute_dtype is not None:
        x = x.astype(compute_dtype)
        weight = weight.astype(compute_dtype)
    elif x.dtype != weight.dtype:
        cdt = jnp.promote_types(x.dtype, weight.dtype)
        x, weight = x.astype(cdt), weight.astype(cdt)

    in_dtype = x.dtype
    out_dtype = x.dtype
    if precision is None:
        precision = (jax.lax.Precision.HIGHEST
                     if jnp.dtype(in_dtype) == jnp.float32
                     else jax.lax.Precision.DEFAULT)

    x2d = x.reshape(-1, nx)
    m = x2d.shape[0]

    in_itemsize = jnp.dtype(in_dtype).itemsize
    out_itemsize = jnp.dtype(out_dtype).itemsize
    capacity = _vmem_capacity_bytes()
    vmem_budget = int(0.8 * capacity)

    tm, tn, tk = _select_tiles(m, nx, nf, in_itemsize, out_itemsize,
                               vmem_budget, tm_cap, tn_cap, tk_cap)

    # Pad every dim up to its tile multiple (zero-padding K is exact; padded
    # M rows / N cols are sliced off the output).
    Mp, Kp, Np = _round_up(m, tm), _round_up(nx, tk), _round_up(nf, tn)
    if (Mp, Kp) != (m, nx):
        x2d = jnp.pad(x2d, ((0, Mp - m), (0, Kp - nx)))
    if (Kp, Np) != (nx, nf):
        weight = jnp.pad(weight, ((0, Kp - nx), (0, Np - nf)))
    b2d = bias.reshape(1, nf)
    if Np != nf:
        b2d = jnp.pad(b2d, ((0, 0), (0, Np - nf)))

    grid = (Mp // tm, Np // tn, Kp // tk)

    footprint = _footprint_bytes(tm, tn, tk, in_itemsize, out_itemsize)
    vmem_limit = int(min(0.9 * capacity, footprint + (8 << 20)))

    out = pl.pallas_call(
        functools.partial(_conv1d_kernel, precision=precision),
        out_shape=jax.ShapeDtypeStruct((Mp, Np), out_dtype),
        grid_spec=pltpu.PrefetchScalarGridSpec(
            num_scalar_prefetch=0,
            grid=grid,
            in_specs=[
                pl.BlockSpec((tm, tk), lambda i, j, k: (i, k)),  # x tile
                pl.BlockSpec((tk, tn), lambda i, j, k: (k, j)),  # w tile (no .T)
                pl.BlockSpec((1, tn), lambda i, j, k: (0, j)),   # bias row
            ],
            out_specs=pl.BlockSpec((tm, tn), lambda i, j, k: (i, j)),
            scratch_shapes=[pltpu.VMEM((tm, tn), jnp.float32)],
        ),
        compiler_params=pltpu.CompilerParams(
            dimension_semantics=("parallel", "parallel", "arbitrary"),
            vmem_limit_bytes=vmem_limit,
        ),
    )(x2d, weight, b2d)

    out = out[:m, :nf]
    return out.reshape(*lead, nf)


# ----------------------------------------------------------------------------
# Self-test
# ----------------------------------------------------------------------------
if __name__ == "__main__":
    key = jax.random.PRNGKey(0)
    kx, kw, kb, kx2, kw2, kb2 = jax.random.split(key, 6)

    # --- Test 1: Conv1D(nf=256, nx=256), x (2, 16, 256); small caps force the
    # real tiled path: grid = (1, 2, 2) -> multi-step K accumulation. ---------
    batch, seq, nx, nf = 2, 16, 256, 256
    x = jax.random.normal(kx, (batch, seq, nx), jnp.float32)
    bound = 1.0 / (nx ** 0.5)
    weight = jax.random.uniform(kw, (nx, nf), jnp.float32, -bound, bound)
    bias = jax.random.uniform(kb, (nf,), jnp.float32, -bound, bound)

    y = conv1d(x, weight, bias, tm_cap=32, tn_cap=128, tk_cap=128)
    y = jax.block_until_ready(y)
    y_ref = (x.reshape(-1, nx) @ weight + bias).reshape(batch, seq, nf)
    assert y.shape == (batch, seq, nf)
    assert jnp.allclose(y, y_ref, atol=1e-4, rtol=1e-4), "f32 mismatch vs reference"

    # bf16 operand path (production setting): bf16 MXU inputs, f32 accumulation.
    y_bf16 = conv1d(x.astype(jnp.bfloat16), weight.astype(jnp.bfloat16), bias,
                    tm_cap=32, tn_cap=128, tk_cap=128)
    y_bf16 = jax.block_until_ready(y_bf16).astype(jnp.float32)
    assert jnp.max(jnp.abs(y_bf16 - y_ref)) < 1e-1, "bf16 mismatch vs reference"

    # --- Test 2: awkward, non-divisible dims exercise the padding path
    # (M=15, nx=200, nf=300 -> padded to 16 x 256 x 384, output sliced back). --
    b2, s2, nx2, nf2 = 3, 5, 200, 300
    x2 = jax.random.normal(kx2, (b2, s2, nx2), jnp.float32)
    w2 = jax.random.uniform(kw2, (nx2, nf2), jnp.float32, -0.05, 0.05)
    bi2 = jax.random.uniform(kb2, (nf2,), jnp.float32, -0.05, 0.05)

    y2 = conv1d(x2, w2, bi2)  # default (large) caps
    y2 = jax.block_until_ready(y2)
    y2_ref = (x2.reshape(-1, nx2) @ w2 + bi2).reshape(b2, s2, nf2)
    assert y2.shape == (b2, s2, nf2)
    assert jnp.allclose(y2, y2_ref, atol=1e-4, rtol=1e-4), "padded-path mismatch"

    print("KERNEL_OK")
</pallas_src>

<mosaic_0001>
module attributes {stable_mosaic.version = 11 : i64} {
  func.func @_conv1d_kernel(%arg0: i32, %arg1: i32, %arg2: i32, %arg3: memref<32x128xf32, #tpu.memory_space<vmem>>, %arg4: memref<128x128xf32, #tpu.memory_space<vmem>>, %arg5: memref<1x128xf32, #tpu.memory_space<vmem>>, %arg6: memref<32x128xf32, #tpu.memory_space<vmem>>, %arg7: memref<32x128xf32, #tpu.memory_space<vmem>>) attributes {dimension_semantics = [#tpu.dimension_semantics<parallel>, #tpu.dimension_semantics<parallel>, #tpu.dimension_semantics<arbitrary>], iteration_bounds = array<i64: 1, 2, 2>, scalar_prefetch = 0 : i64, scratch_operands = 1 : i64, tpu.core_type = #tpu.core_type<tc>, window_params = [{transform_indices = @transform_0, window_bounds = array<i64: 32, 128>}, {transform_indices = @transform_1, window_bounds = array<i64: 128, 128>}, {transform_indices = @transform_2, window_bounds = array<i64: 1, 128>}, {transform_indices = @transform_3, window_bounds = array<i64: 32, 128>}]} {
    %c0_i32 = arith.constant 0 : i32
    %0 = arith.cmpi eq, %arg2, %c0_i32 : i32
    %1 = arith.extui %0 : i1 to i32
    %c0_i32_0 = arith.constant 0 : i32
    %2 = arith.cmpi ne, %1, %c0_i32_0 : i32
    scf.if %2 {
      %cst_9 = arith.constant 0.000000e+00 : f32
      %12 = vector.broadcast %cst_9 : f32 to vector<32x128xf32>
      %c0_10 = arith.constant 0 : index
      %c0_11 = arith.constant 0 : index
      %13 = vector.load %arg7[%c0_10, %c0_11] : memref<32x128xf32, #tpu.memory_space<vmem>>, vector<32x128xf32>
      tpu.vector_store %arg7[%c0_10, %c0_11], %12 {strides = array<i32>} : memref<32x128xf32, #tpu.memory_space<vmem>>, vector<32x128xf32>,
    } else {
    }
    %c0 = arith.constant 0 : index
    %c0_1 = arith.constant 0 : index
    %3 = vector.load %arg7[%c0, %c0_1] : memref<32x128xf32, #tpu.memory_space<vmem>>, vector<32x128xf32>
    %c0_2 = arith.constant 0 : index
    %c0_3 = arith.constant 0 : index
    %4 = vector.load %arg3[%c0_2, %c0_3] : memref<32x128xf32, #tpu.memory_space<vmem>>, vector<32x128xf32>
    %c0_4 = arith.constant 0 : index
    %c0_5 = arith.constant 0 : index
    %5 = vector.load %arg4[%c0_4, %c0_5] : memref<128x128xf32, #tpu.memory_space<vmem>>, vector<128x128xf32>
    %cst = arith.constant dense<0.000000e+00> : vector<32x128xf32>
    %6 = tpu.matmul %4, %5, %cst {dimension_numbers = #tpu.dot_dimension_numbers<[1], [0], [0], [1], [0, 0, 1, 1], [], []>, precision = #tpu.contract_precision<fp32>} : vector<32x128xf32>, vector<128x128xf32>, vector<32x128xf32> -> vector<32x128xf32>
    %7 = arith.addf %3, %6 : vector<32x128xf32>
    %c0_6 = arith.constant 0 : index
    %c0_7 = arith.constant 0 : index
    %8 = vector.load %arg7[%c0_6, %c0_7] : memref<32x128xf32, #tpu.memory_space<vmem>>, vector<32x128xf32>
    tpu.vector_store %arg7[%c0_6, %c0_7], %7 {strides = array<i32>} : memref<32x128xf32, #tpu.memory_space<vmem>>, vector<32x128xf32>,
    %c1_i32 = arith.constant 1 : i32
    %9 = arith.cmpi eq, %arg2, %c1_i32 : i32
    %10 = arith.extui %9 : i1 to i32
    %c0_i32_8 = arith.constant 0 : i32
    %11 = arith.cmpi ne, %10, %c0_i32_8 : i32
    scf.if %11 {
      %c0_9 = arith.constant 0 : index
      %c0_10 = arith.constant 0 : index
      %12 = vector.load %arg7[%c0_9, %c0_10] : memref<32x128xf32, #tpu.memory_space<vmem>>, vector<32x128xf32>
      %c0_11 = arith.constant 0 : index
      %c0_12 = arith.constant 0 : index
      %13 = vector.load %arg5[%c0_11, %c0_12] : memref<1x128xf32, #tpu.memory_space<vmem>>, vector<1x128xf32>
      %14 = vector.broadcast %13 : vector<1x128xf32> to vector<32x128xf32>
      %15 = arith.addf %12, %14 : vector<32x128xf32>
      %c0_13 = arith.constant 0 : index
      %c0_14 = arith.constant 0 : index
      %16 = vector.load %arg6[%c0_13, %c0_14] : memref<32x128xf32, #tpu.memory_space<vmem>>, vector<32x128xf32>
      tpu.vector_store %arg6[%c0_13, %c0_14], %15 {strides = array<i32>} : memref<32x128xf32, #tpu.memory_space<vmem>>, vector<32x128xf32>,
    } else {
    }
    return
  }
  func.func @transform_0(%arg0: i32, %arg1: i32, %arg2: i32) -> (i32, i32) {
    %c0_i32 = arith.constant 0 : i32
    return %arg0, %arg2 : i32, i32
  }
  func.func @transform_1(%arg0: i32, %arg1: i32, %arg2: i32) -> (i32, i32) {
    %c0_i32 = arith.constant 0 : i32
    return %arg2, %arg1 : i32, i32
  }
  func.func @transform_2(%arg0: i32, %arg1: i32, %arg2: i32) -> (i32, i32) {
    %c0_i32 = arith.constant 0 : i32
    %c0_i32_0 = arith.constant 0 : i32
    return %c0_i32, %arg1 : i32, i32
  }
  func.func @transform_3(%arg0: i32, %arg1: i32, %arg2: i32) -> (i32, i32) {
    %c0_i32 = arith.constant 0 : i32
    return %arg0, %arg1 : i32, i32
  }
}

</mosaic_0001>

<bundles_post_ra>
// kernel: tpu_custom_call.1
= control target key start
LH: loop header
LB: loop body
LE: loop exit
PB: predicated region body
PF: predicated region fallthrough
CT: control target
= control target key end

     0   :  { %s2905_s0 = inlined_call_operand.hbm [shape: f32[32,256], index: 0, kind: input, shape index: {}]   ;;  %s2906_s1 = inlined_call_operand.hbm [shape: f32[256,256], index: 1, kind: input, shape index: {}]   ;;  %s2907_s2 = inlined_call_operand.vmem [shape: f32[1,256], index: 2, kind: input, shape index: {}]   ;;  %s2908_s3 = inlined_call_operand.hbm [shape: f32[32,256], index: 3, kind: output, shape index: {}]  }
   0x1   :  { %2924 = sst [smem:[#allocation17_spill]] %s2905_s0 }
   0x2   :  { %2925 = sst [smem:[#allocation18_spill]] %s2908_s3 }
   0x3   :  { %8 = vsyncpa [#allocation4], 0 }
   0x4   :  { %10 = vsyncpa [#allocation4 + $0x1], 0 }
   0x5   :  { %11 = vsyncpa [#allocation7], 0 }
   0x6   :  { %13 = vsyncpa [#allocation7 + $0x1], 0 }
   0x7   :  { %14 = vsyncpa [#allocation5], 0 }
   0x8   :  { %16 = vsyncpa [#allocation5 + $0x1], 0  ;;  %s2211_s12 = smov 0   ;;  %s2213_s13 = smov 0  }
   0x9   :  { %s2215_s14 = smov 0   ;;  %s2217_s15 = smov 0  }
   0xa   :  { %s2219_s16 = smov 0   ;;  %s2221_s17 = smov 0  }
   0xb   :  { %s2223_s18 = smov 0   ;;  %s2225_s19 = smov 0  }
   0xc   :  { %s2227_s20 = smov 0   ;;  %s2229_s21 = smov 0  }
   0xd   :  { %s2231_s22 = smov 0   ;;  %s2233_s23 = smov 0  }
   0xe   :  { %s2235_s24 = smov 0   ;;  %s2237_s25 = smov 0  }
   0xf LB: > { %2926 = sst [smem:[#allocation12_spill]] %s2159_s20  ;;  %s1249_s26 = sadd.s32 4294967295, %s2179_s25   ;;  %s2179_s25 = sphi %s2237_s25, %s22_s25   ;;  %s2175_s24 = sphi %s2235_s24, %s2976_s24   ;;  %s2171_s23 = sphi %s2233_s23, %s2975_s23   ;;  %s2167_s22 = sphi %s2231_s22, %s2974_s22   ;;  %s2163_s21 = sphi %s2229_s21, %s2973_s21   ;;  %s2159_s20 = sphi %s2227_s20, %s2962_s20   ;;  %s2155_s19 = sphi %s2225_s19, %s2972_s19   ;;  %s2151_s18 = sphi %s2223_s18, %s2971_s18   ;;  %s2147_s17 = sphi %s2221_s17, %s2970_s17   ;;  %s2143_s16 = sphi %s2219_s16, %s2969_s16   ;;  %s2139_s15 = sphi %s2217_s15, %s2968_s15   ;;  %s2135_s14 = sphi %s2215_s14, %s2967_s14   ;;  %s2131_s13 = sphi %s2213_s13, %s2966_s13   ;;  %s2127_s12 = sphi %s2211_s12, %s2965_s12  }
  0x10   : > { %2927 = sst [smem:[#allocation13_spill]] %s2163_s21  ;;  %s34_s27 = sadd.s32 1, %s2171_s23 }
  0x11   : > { %p2281_p0 = scmp.ge.s32.totalorder %s34_s27, 2  ;;  %s50_s29 = sadd.s32 1, %s2159_s20 }
  0x12   : > { %p57_p1 = scmp.ne.s32.totalorder %s2159_s20, %s2155_s19  ;;  %p2912_p2 = scmp.eq.s32.totalorder %s2179_s25, 0 }
  0x13   : > { %s2978_s27 = smov (%p2281_p0, %s34_s27), 0  ;;  %p63_p4 = scmp.ne.s32.totalorder %s2155_s19, %s2151_s18 }
  0x14   : > { %2929 = sst [smem:[#allocation14_spill]] %s2978_s27  ;;  %p2295_p3 = por %p2912_p2, %p57_p1 }
  0x15   : > { %s2302_s4 = ssub.s32 %s2171_s23, %s2978_s27  ;;  %p2304_p5 = scmp.eq.s32.totalorder %s1249_s26, 0 }
  0x16   : > { %p48_p6 = scmp.eq.s32.totalorder %s2302_s4, 0  ;;  %p2309_p7 = scmp.eq.s32.totalorder %s1249_s26, 3 }
  0x17   : > { %s2931_s5 = scalar_select %p2304_p5, 1, 0 }
  0x18   : > { %s2932_s6 = scalar_select %p2309_p7, 1, 0 }
  0x19   : > { %p2315_p8 = por %p2304_p5, %p63_p4  ;;  %p2911_p9 = scmp.lt.s32.totalorder %s2179_s25, 4 }
  0x1a   : > { %s2320_s8 = scalar_select %p48_p6, %s2159_s20, %s50_s29  }
  0x1b   : > { %s2933_s7 = scalar_select %p2315_p8, 1, 0 }
  0x1c   : > { %2934 = sst [smem:[#allocation15_spill]] %s2320_s8  ;;  %s169_s9 = sand.u32 1, %s2159_s20  }
  0x1d   : > { %s1253_s10 = sshll.u32 %s169_s9, 5  ;;  %s1254_s11 = sshll.u32 %s2171_s23, 7 }
  0x1e   : > { %s2935_s0 = sld [smem:[#allocation17_spill]]  ;;  %s173_s26 = scalar_lea.vmem [#allocation3], %s1253_s10 }
  0x1f   : > { %s182_s21 = sshll.u32 %s173_s26, 4  ;;  %p2336_p10 = pnand %p2911_p9, %p2295_p3  ;;  %s2330_s21 = int_to_ptr.vmem [resolvable:$true] %s182_s21 }
  0x20   : > { %s2340_s8 = scalar_lea.sflag [#allocation4], %s169_s9 }
  0x21   : > { %p1971_p12 = pneg %p2336_p10 }
  0x24   : > { %s2328_s3 = scalar_lea.hbm %s2935_s0, %s1254_s11  ;;  %s1974_s30 = scalar_lea.hbm %s2935_s0, 1024 }
  0x25   : > { %s1969_s27 = scalar_lea.hbm %s2328_s3, 512  ;;  %p1975_p3 = scmp.lt.u32.totalorder %s2328_s3, %s2935_s0 }
  0x26   : > { %p1970_p11 = scmp.ne.s32.totalorder %s2328_s3, %s1969_s27  ;;  %p1976_p4 = scmp.lt.u32.totalorder %s1974_s30, %s1969_s27 }
  0x27   : > { %p1978_p9 = scmp.lt.u32.totalorder %s1969_s27, %s2328_s3 }
  0x28   : > { %p1972_p13 = pnand %p1971_p12, %p1970_p11  ;;  %p1977_p6 = por %p1976_p4, %p1975_p3 }
  0x2a   : > { %p1973_p1 = pneg %p1972_p13  ;;  %p1979_p2 = por %p1978_p9, %p1977_p6 }
  0x2c   : > { %p1980_p8 = pnand %p1979_p2, %p1973_p1 }
  0x2e   : > { %1983 = shalt.err (!%p1980_p8)
}
  0x2f   : > { %s1984_s9 = scalar_lea.vmem %s2330_s21, 512  ;;  %s2181_s10 = smov [#allocation3]  }
  0x30   : > { %p1985_p11 = scmp.ne.s32.totalorder %s2330_s21, %s1984_s9  ;;  %s1989_s11 = sshll.u32 %s2181_s10, 4  ;;  %s1990_s11 = int_to_ptr.vmem [resolvable:$false] %s1989_s11 }
  0x31   : > { %s1991_s18 = scalar_lea.vmem %s1990_s11, 1024  ;;  %p1992_p5 = scmp.lt.s32.totalorder %s2330_s21, %s1990_s11 }
  0x32   : > { %p1987_p13 = pnand %p1985_p11, %p1971_p12  ;;  %p1993_p3 = scmp.lt.s32.totalorder %s1991_s18, %s1984_s9 }
  0x34   : > { %p1988_p7 = pneg %p1987_p13  ;;  %p1994_p4 = por %p1993_p3, %p1992_p5 }
  0x36   : > { %p1995_p9 = pnand %p1994_p4, %p1988_p7 }
  0x38   : > { %1998 = shalt.err (!%p1995_p9)
}
  0x39   : > { %s2915_s27 = smov 256   ;;  %s2916_s30 = smov 128  }
  0x3a   : > { %s2917_s26 = smov 8   ;;  %p1259_p2 = scmp.ge.s32.totalorder %s2179_s25, 1 }
  0x3b   : > { %1840 = dma.hbm_to_vmem [thread:$0]  (!%p2336_p10), %s2328_s3, 512, %s2330_s21, %s2340_s8, %s2915_s27, %s2916_s30, %s2917_s26  }
  0x3c   : > { %p219_p5 = scmp.lt.s32.totalorder %s2179_s25, 5  ;;  %s1250_s10 = sadd.s32 4294967294, %s2179_s25  }
  0x3d   : > { %s37_s11 = sadd.s32 1, %s2175_s24  ;;  %s78_s18 = sadd.s32 1, %s2147_s17 }
  0x3e   : > { %p2373_p7 = pnand %p1259_p2, %p219_p5  ;;  %s2980_s11 = smov (!%p2281_p0, %s37_s11), %s2175_s24 }
  0x3f   : > { %p85_p8 = scmp.ne.s32.totalorder %s2147_s17, %s2143_s16  ;;  %p91_p10 = scmp.ne.s32.totalorder %s2143_s16, %s2139_s15 }
  0x40   : > { %p39_p12 = scmp.ge.s32.totalorder %s2980_s11, 2  ;;  %s132_s3 = sadd.s32 1, %s2135_s14 }
  0x41   : > { %p2938_p1 = scmp.eq.s32.totalorder %s2179_s25, 0  ;;  %p2940_p11 = scmp.ne.s32.totalorder %s2931_s5, 0 }
  0x42   : > { %s2982_s11 = smov (%p39_p12, %s2980_s11), 0  ;;  %p142_p0 = scmp.ne.s32.totalorder %s2135_s14, %s2131_s13 }
  0x43   : > { %p2390_p6 = por %p85_p8, %p2938_p1  ;;  %p2396_p13 = por %p91_p10, %p2940_p11 }
  0x44   : > { %2942 = sst [smem:[#allocation16_spill]] %s2982_s11  ;;  %p148_p3 = scmp.ne.s32.totalorder %s2131_s13, %s2127_s12 }
  0x45   : > { %s2941_s8 = scalar_select %p2396_p13, 1, 0 }
  0x46   : > { %s74_s15 = ssub.s32 %s2175_s24, %s2982_s11  ;;  %p149_p4 = scmp.eq.s32.totalorder %s1250_s10, 3 }
  0x47   : > { %s75_s28 = sor.u32 %s74_s15, %s2302_s4  ;;  %p130_p9 = scmp.eq.s32.totalorder %s74_s15, 0 }
  0x48   : > { %p76_p2 = scmp.eq.s32.totalorder %s75_s28, 0  ;;  %p2943_p5 = scmp.ne.s32.totalorder %s2932_s6, 0 }
  0x49   : > { %s2416_s29 = scalar_select %p130_p9, %s2135_s14, %s132_s3  }
  0x4a   : > { %p2411_p8 = por %p2943_p5, %p142_p0  ;;  %p2421_p10 = por %p149_p4, %p148_p3 }
  0x4b   : > { %s2419_s27 = scalar_select %p76_p2, %s2147_s17, %s78_s18  }
  0x4c   : > { %s2944_s5 = scalar_select %p2411_p8, 1, 0 }
  0x4d   : > { %s2945_s30 = scalar_select %p2421_p10, 1, 0 }
  0x4e   : > { %s192_s26 = sand.u32 1, %s2147_s17   ;;  %s1270_s4 = sshll.u32 %s2171_s23, 5 }
  0x4f   : > { %s1255_s10 = sshll.u32 %s192_s26, 7  ;;  %s202_s0 = sadd.s32 %s2175_s24, %s1270_s4 }
  0x50   : > { %s196_s11 = scalar_lea.vmem [#allocation6], %s1255_s10  ;;  %s1258_s28 = sshll.u32 %s202_s0, 7 }
  0x51   : > { %s205_s15 = sshll.u32 %s196_s11, 4  ;;  %s2433_s3 = scalar_lea.hbm %s2906_s1, %s1258_s28  ;;  %s2428_s15 = int_to_ptr.vmem [resolvable:$true] %s205_s15 }
  0x52   : > { %p2946_p12 = scmp.lt.s32.totalorder %s2179_s25, 4  ;;  %s2443_s0 = scalar_lea.sflag [#allocation7], %s192_s26 }
  0x53   : > { %s1999_s11 = scalar_lea.hbm %s2433_s3, 2048  ;;  %s2004_s10 = scalar_lea.hbm %s2906_s1, 8192 }
  0x54   : > { %p2439_p1 = pnand %p2946_p12, %p2390_p6  ;;  %p2000_p11 = scmp.ne.s32.totalorder %s2433_s3, %s1999_s11 }
  0x55   : > { %p2005_p6 = scmp.lt.u32.totalorder %s2433_s3, %s2906_s1  ;;  %p2006_p9 = scmp.lt.u32.totalorder %s2004_s10, %s1999_s11 }
  0x56   : > { %p2001_p0 = pneg %p2439_p1  ;;  %p2008_p5 = scmp.lt.u32.totalorder %s1999_s11, %s2433_s3 }
  0x57   : > { %p2007_p2 = por %p2006_p9, %p2005_p6 }
  0x58   : > { %p2002_p3 = pnand %p2001_p0, %p2000_p11 }
  0x59   : > { %p2009_p12 = por %p2008_p5, %p2007_p2 }
  0x5a   : > { %p2003_p4 = pneg %p2002_p3 }
  0x5c   : > { %p2010_p10 = pnand %p2009_p12, %p2003_p4 }
  0x5e   : > { %2013 = shalt.err (!%p2010_p10)
}
  0x5f   : > { %s2014_s26 = scalar_lea.vmem %s2428_s15, 2048  ;;  %s2185_s6 = smov [#allocation6]  }
  0x60   : > { %p2015_p11 = scmp.ne.s32.totalorder %s2428_s15, %s2014_s26  ;;  %s2019_s20 = sshll.u32 %s2185_s6, 4  ;;  %s2020_s20 = int_to_ptr.vmem [resolvable:$false] %s2019_s20 }
  0x61   : > { %s2021_s21 = scalar_lea.vmem %s2020_s20, 4096  ;;  %p2022_p13 = scmp.lt.s32.totalorder %s2428_s15, %s2020_s20 }
  0x62   : > { %p2017_p3 = pnand %p2015_p11, %p2001_p0  ;;  %p2023_p6 = scmp.lt.s32.totalorder %s2021_s21, %s2014_s26 }
  0x64   : > { %p2018_p8 = pneg %p2017_p3  ;;  %p2024_p9 = por %p2023_p6, %p2022_p13 }
  0x66   : > { %p2025_p2 = pnand %p2024_p9, %p2018_p8 }
  0x68   : > { %2028 = shalt.err (!%p2025_p2)
}
  0x69   : > { %s2948_s11 = smov 8   ;;  %s2949_s10 = smov 128  }
  0x6a   : > { %s2950_s4 = smov 256   ;;  %223 = sbr.rel (%p2373_p7) target bundleno = 495 (0x1ef), region = 32 }
  0x6b   : > { %1843 = dma.hbm_to_vmem [thread:$0]  (!%p2439_p1), %s2433_s3, 2048, %s2428_s15, %s2443_s0, %s2950_s4, %s2949_s10, %s2948_s11  }
  0x6c   : > { %s225_s28 = sand.u32 (!%p2373_p7), 1, %s2155_s19   ;;  %p2951_p13 = scmp.ne.s32.totalorder (!%p2373_p7), %s2933_s7, 0 }
  0x6d   : > { %s1260_s6 = sshll.u32 (!%p2373_p7), %s225_s28, 5  ;;  %s226_s26 = scalar_lea.sflag (!%p2373_p7), [#allocation4], %s225_s28 }
  0x6e   : > { %s2477_s20 = scalar_lea.vmem (!%p2373_p7), [#allocation3], %s1260_s6 }
  0x71   : > { %2114 = dma.done.wait (%p2951_p13), %s226_s26, 512  }
  0x72   : > { %2116 = vsyncadd (%p2951_p13), %s226_s26, 4294966784  ;;  %s234_s18 = sand.u32 1, %s2143_s16   ;;  %p2952_p7 = scmp.ne.s32.totalorder %s2941_s8, 0 }
  0x73   : > { %s1261_s21 = sshll.u32 %s234_s18, 7  ;;  %s235_s15 = scalar_lea.sflag [#allocation7], %s234_s18 }
  0x74   : > { %s2484_s3 = scalar_lea.vmem [#allocation6], %s1261_s21 }
  0x75   : > { %2118 = dma.done.wait (%p2952_p7), %s235_s15, 2048  }
  0x76   : > { %2120 = vsyncadd (%p2952_p7), %s235_s15, 4294965248  ;;  %s266_s9 = sand.u32 1, %s2131_s13   ;;  %p271_p8 = scmp.lt.s32.totalorder %s2167_s22, 1 }
  0x77   : > { %s1262_s7 = sshll.u32 %s266_s9, 5  ;;  %s2953_s6 = sld [smem:[#allocation13_spill]] }
  0x78   : > { %s2495_s0 = scalar_select %p271_p8, %s2167_s22, 1 }
  0x79   : > { %s2501_s28 = scalar_lea.vmem [#allocation8], %s1262_s7 }
  0x7a   : > { %s273_s4 = scalar_lea.vmem %s2907_s2, %s2495_s0 }
  0x7d   : > { %p1263_p10 = scmp.ne.s32.totalorder %s2953_s6, 0 }
  0x7e   : > { %v2186_v0 = vmov (!%p1263_p10), 0.0  }
  0x7f   : > { %278 = sbr.rel (%p1263_p10) target bundleno = 134 (0x86), region = 44  ;;  %279 = vst [vmem:[#allocation2] sm:$0xff] (!%p1263_p10), %v2186_v0  ;;  %280 = vst [vmem:[#allocation2 + $0x8] sm:$0xff] (!%p1263_p10), %v2186_v0 }
  0x80   : > { %281 = vst [vmem:[#allocation2 + $0x10] sm:$0xff] (!%p1263_p10), %v2186_v0  ;;  %282 = vst [vmem:[#allocation2 + $0x18] sm:$0xff] (!%p1263_p10), %v2186_v0 }
  0x86 PF: > { %v291_v1 = vld [vmem:[%s2484_s3] sm:$0xff]  ;;  %v292_v2 = vld [vmem:[%s2484_s3 + $0x8] sm:$0xff]  ;;  %v293_v3 = vld [vmem:[%s2484_s3 + $0x10] sm:$0xff]  ;;  %s2956_s8 = sld [smem:[#allocation13_spill]] }
  0x87   : > { %v308_v4 = vand.u32 4294901760, %v291_v1  ;;  %v311_v5 = vand.u32 4294901760, %v292_v2  ;;  %v294_v6 = vld [vmem:[%s2484_s3 + $0x18] sm:$0xff]  ;;  %v314_v7 = vand.u32 4294901760, %v293_v3  ;;  %v2509_v8 = vld [vmem:[%s2484_s3 + $0x20] sm:$0xff]  ;;  %v2512_v9 = vld [vmem:[%s2484_s3 + $0x28] sm:$0xff] }
  0x88   : > { %v317_v10 = vand.u32 4294901760, %v294_v6  ;;  %v320_v12 = vand.u32 4294901760, %v2509_v8  ;;  %v323_v13 = vand.u32 4294901760, %v2512_v9  ;;  %v2521_v15 = vld [vmem:[%s2484_s3 + $0x30] sm:$0xff]  ;;  %v2524_v16 = vld [vmem:[%s2484_s3 + $0x38] sm:$0xff]  ;;  %v287_v17 = vld [vmem:[%s2477_s20] sm:$0xff] }
  0x89   : > { %v2514_v11 = vpack.c.bf16 %v311_v5, %v308_v4  ;;  %v2531_v18 = vand.u32 4294901760, %v287_v17  ;;  %v326_v20 = vand.u32 4294901760, %v2521_v15  ;;  %v329_v21 = vand.u32 4294901760, %v2524_v16  ;;  %v2544_v22 = vld [vmem:[%s2484_s3 + $0x40] sm:$0xff]  ;;  %v2547_v23 = vld [vmem:[%s2484_s3 + $0x48] sm:$0xff]  ;;  %v2566_v29 = vld [vmem:[%s2484_s3 + $0x50] sm:$0xff] }
  0x8a   : > { %v2518_v14 = vpack.c.bf16 %v317_v10, %v314_v7  ;;  %v2539_v19 = vpack.c.bf16 %v323_v13, %v320_v12  ;;  %v332_v27 = vand.u32 4294901760, %v2544_v22  ;;  %v335_v28 = vand.u32 4294901760, %v2547_v23  ;;  %v2569_v30 = vld [vmem:[%s2484_s3 + $0x58] sm:$0xff]  ;;  %v288_v34 = vld [vmem:[%s2477_s20 + $0x8] sm:$0xff]  ;;  %v2586_v37 = vld [vmem:[%s2484_s3 + $0x60] sm:$0xff] }
  0x8b   : > { %1620 = vmatprep.subr.bf16.mxu1 %v2514_v11  ;;  %1716 = vmatprep.subr.bf16.mxu0 %v2514_v11  ;;  %v2550_v24 = vsub.f32 %v287_v17, %v2531_v18  ;;  %v2561_v26 = vpack.c.bf16 %v329_v21, %v326_v20  ;;  %v338_v32 = vand.u32 4294901760, %v2566_v29  ;;  %v341_v36 = vand.u32 4294901760, %v2569_v30  ;;  %v2589_v38 = vld [vmem:[%s2484_s3 + $0x68] sm:$0xff]  ;;  %v2596_v41 = vld [vmem:[%s2484_s3 + $0x70] sm:$0xff]  ;;  %v2609_v47 = vld [vmem:[%s2484_s3 + $0x78] sm:$0xff] }
  0x8c   : > { %1622 = vmatpush3.bf16.msra.mxu1 %v2514_v11  ;;  %1718 = vmatpush3.bf16.msra.mxu0 %v2514_v11  ;;  %v2582_v35 = vpack.c.bf16 %v335_v28, %v332_v27  ;;  %v2591_v39 = vsub.f32 %v291_v1, %v308_v4  ;;  %v2593_v40 = vsub.f32 %v292_v2, %v311_v5  ;;  %v2598_v42 = vand.u32 4294901760, %v288_v34  ;;  %v289_v56 = vld [vmem:[%s2477_s20 + $0x10] sm:$0xff]  ;;  %v290_v63 = vld [vmem:[%s2477_s20 + $0x18] sm:$0xff]  ;;  %p1264_p1 = scmp.ne.s32.totalorder %s2956_s8, 1 }
  0x8d   : > { %1624 = vmatprep.subr.bf16.mxu1 %v2518_v14  ;;  %1720 = vmatprep.subr.bf16.mxu0 %v2518_v14  ;;  %v390_v25 = vand.u32 4294901760, %v2550_v24  ;;  %v2600_v43 = vsub.f32 %v293_v3, %v314_v7  ;;  %v2602_v44 = vsub.f32 %v294_v6, %v317_v10  ;;  %v344_v45 = vand.u32 4294901760, %v2586_v37 }
  0x8e   : > { %v347_v46 = vand.u32 4294901760, %v2589_v38  ;;  %v2617_v48 = vpack.c.bf16 %v341_v36, %v338_v32  ;;  %v431_v49 = vand.u32 4294901760, %v2591_v39  ;;  %v438_v50 = vand.u32 4294901760, %v2593_v40 }
  0x8f   : > { %v391_v31 = vsub.f32 %v2550_v24, %v390_v25  ;;  %1537 = vmatprep.mubr.f32.mxu0 %v390_v25  ;;  %v2923_v51 = vand.u32 4294901760, %v2596_v41  ;;  %v2922_v52 = vand.u32 4294901760, %v2609_v47  ;;  %v2624_v53 = vsub.f32 %v288_v34, %v2598_v42 }
  0x90   : > { %1626 = vmatpush3.bf16.msra.mxu1 %v2518_v14  ;;  %1722 = vmatpush3.bf16.msra.mxu0 %v2518_v14  ;;  %v445_v54 = vand.u32 4294901760, %v2600_v43  ;;  %v452_v55 = vand.u32 4294901760, %v2602_v44  ;;  %v2635_v57 = vpack.c.bf16 %v347_v46, %v344_v45  ;;  %v2640_v58 = vsub.f32 %v2509_v8, %v320_v12 }
  0x91   : > { %1628 = vmatprep.subr.bf16.mxu1 %v2539_v19  ;;  %1724 = vmatprep.subr.bf16.mxu0 %v2539_v19  ;;  %v392_v33 = vand.u32 4294901760, %v391_v31  ;;  %v432_v59 = vsub.f32 %v2591_v39, %v431_v49  ;;  %v439_v60 = vsub.f32 %v2593_v40, %v438_v50  ;;  %v2649_v61 = vsub.f32 %v2512_v9, %v323_v13 }
  0x92   : > { %v2651_v62 = vand.u32 4294901760, %v289_v56  ;;  %v2658_v0 = vpack.c.bf16 %v2922_v52, %v2923_v51  ;;  %v400_v1 = vand.u32 4294901760, %v2624_v53  ;;  %v446_v2 = vsub.f32 %v2600_v43, %v445_v54 }
  0x93   : > { %1423 = vmatprep.mubr.f32.mxu1 %v392_v33  ;;  %v453_v3 = vsub.f32 %v2602_v44, %v452_v55  ;;  %v459_v4 = vand.u32 4294901760, %v2640_v58  ;;  %v2669_v5 = vsub.f32 %v2521_v15, %v326_v20  ;;  %v2674_v6 = vsub.f32 %v2524_v16, %v329_v21 }
  0x94   : > { %1630 = vmatpush3.bf16.msra.mxu1 %v2539_v19  ;;  %1726 = vmatpush3.bf16.msra.mxu0 %v2539_v19  ;;  %v2677_v7 = vsub.f32 %v289_v56, %v2651_v62  ;;  %v433_v8 = vand.u32 4294901760, %v432_v59  ;;  %v440_v9 = vand.u32 4294901760, %v439_v60  ;;  %v466_v10 = vand.u32 4294901760, %v2649_v61 }
  0x95   : > { %1632 = vmatprep.subr.bf16.mxu1 %v2561_v26  ;;  %1728 = vmatprep.subr.bf16.mxu0 %v2561_v26  ;;  %v2682_v12 = vand.u32 4294901760, %v290_v63  ;;  %v1747_v13 = vpack.c.bf16 %v438_v50, %v431_v49  ;;  %v401_v17 = vsub.f32 %v2624_v53, %v400_v1  ;;  %v447_v16 = vand.u32 4294901760, %v446_v2 }
  0x96   : > { %v410_v15 = vand.u32 4294901760, %v2677_v7  ;;  %v2689_v20 = vsub.f32 %v2544_v22, %v332_v27  ;;  %v454_v25 = vand.u32 4294901760, %v453_v3  ;;  %v460_v31 = vsub.f32 %v2640_v58, %v459_v4 }
  0x97   : > { %v2692_v21 = vsub.f32 %v290_v63, %v2682_v12  ;;  %v473_v33 = vand.u32 4294901760, %v2669_v5  ;;  %v480_v34 = vand.u32 4294901760, %v2674_v6  ;;  %v1651_v22 = vpack.c.bf16 %v440_v9, %v433_v8 }
  0x98   : > { %1634 = vmatpush3.bf16.msra.mxu1 %v2561_v26  ;;  %1730 = vmatpush3.bf16.msra.mxu0 %v2561_v26  ;;  %v467_v27 = vsub.f32 %v2649_v61, %v466_v10  ;;  %v2705_v49 = vsub.f32 %v2547_v23, %v335_v28  ;;  %v1751_v56 = vpack.c.bf16 %v452_v55, %v445_v54  ;;  %v402_v60 = vand.u32 4294901760, %v401_v17 }
  0x99   : > { %1636 = vmatprep.subr.bf16.mxu1 %v2582_v35  ;;  %1732 = vmatprep.subr.bf16.mxu0 %v2582_v35  ;;  %v420_v50 = vand.u32 4294901760, %v2692_v21  ;;  %v411_v59 = vsub.f32 %v2677_v7, %v410_v15  ;;  %v487_v63 = vand.u32 4294901760, %v2689_v20  ;;  %v2713_v2 = vsub.f32 %v2566_v29, %v338_v32 }
  0x9a   : > { %v474_v23 = vsub.f32 %v2669_v5, %v473_v33  ;;  %v481_v28 = vsub.f32 %v2674_v6, %v480_v34  ;;  %v2723_v54 = vsub.f32 %v2569_v30, %v341_v36  ;;  %v1655_v55 = vpack.c.bf16 %v454_v25, %v447_v16 }
  0x9b   : > { %v421_v3 = vsub.f32 %v2692_v21, %v420_v50  ;;  %v461_v29 = vand.u32 4294901760, %v460_v31  ;;  %v468_v32 = vand.u32 4294901760, %v467_v27  ;;  %v494_v8 = vand.u32 4294901760, %v2705_v49 }
  0x9c   : > { %1638 = vmatpush3.bf16.msra.mxu1 %v2582_v35  ;;  %1734 = vmatpush3.bf16.msra.mxu0 %v2582_v35  ;;  %v412_v9 = vand.u32 4294901760, %v411_v59  ;;  %v1755_v17 = vpack.c.bf16 %v466_v10, %v459_v4  ;;  %v488_v52 = vsub.f32 %v2689_v20, %v487_v63  ;;  %v2730_v51 = vsub.f32 %v2586_v37, %v344_v45 }
  0x9d   : > { %1640 = vmatprep.subr.bf16.mxu1 %v2617_v48  ;;  %1736 = vmatprep.subr.bf16.mxu0 %v2617_v48  ;;  %v422_v30 = vand.u32 4294901760, %v421_v3  ;;  %v475_v36 = vand.u32 4294901760, %v474_v23  ;;  %v482_v16 = vand.u32 4294901760, %v481_v28  ;;  %v501_v25 = vand.u32 4294901760, %v2713_v2 }
  0x9e   : > { %v508_v31 = vand.u32 4294901760, %v2723_v54  ;;  %v495_v4 = vsub.f32 %v2705_v49, %v494_v8  ;;  %v2738_v10 = vsub.f32 %v2589_v38, %v347_v46  ;;  %v1759_v37 = vpack.c.bf16 %v480_v34, %v473_v33 }
  0x9f   : > { %v489_v45 = vand.u32 4294901760, %v488_v52  ;;  %v515_v59 = vand.u32 4294901760, %v2730_v51  ;;  %v2954_v46 = vand.u32 4294901760, %v2596_v41  ;;  %v1763_v34 = vpack.c.bf16 %v494_v8, %v487_v63 }
  0xa0   : > { %1642 = vmatpush3.bf16.msra.mxu1 %v2617_v48  ;;  %1738 = vmatpush3.bf16.msra.mxu0 %v2617_v48  ;;  %v509_v27 = vsub.f32 %v2723_v54, %v508_v31  ;;  %v522_v38 = vand.u32 4294901760, %v2738_v10 }
  0xa1   : > { %1644 = vmatprep.subr.bf16.mxu1 %v2635_v57  ;;  %1740 = vmatprep.subr.bf16.mxu0 %v2635_v57  ;;  %v2747_v52 = vsub.f32 %v2596_v41, %v2954_v46  ;;  %v516_v3 = vsub.f32 %v2730_v51, %v515_v59 }
  0xa2   : > { %v523_v23 = vsub.f32 %v2738_v10, %v522_v38 }
  0xa3   : > { %v529_v28 = vand.u32 4294901760, %v2747_v52  ;;  %v517_v63 = vand.u32 4294901760, %v516_v3 }
  0xa4   : > { %1646 = vmatpush3.bf16.msra.mxu1 %v2635_v57  ;;  %1742 = vmatpush3.bf16.msra.mxu0 %v2635_v57 }
  0xa5   : > { %1648 = vmatprep.subr.bf16.mxu1 %v2658_v0  ;;  %1744 = vmatprep.subr.bf16.mxu0 %v2658_v0  ;;  %v530_v8 = vsub.f32 %v2747_v52, %v529_v28 }
  0xa8   : > { %1650 = vmatpush3.bf16.msra.mxu1 %v2658_v0  ;;  %1746 = vmatpush3.bf16.msra.mxu0 %v2658_v0 }
  0xa9   : > { %1652 = vmatprep.subr.bf16.mxu1 %v1651_v22  ;;  %1748 = vmatprep.subr.bf16.mxu0 %v1747_v13 }
  0xab   : > { %1424 = vmatmul.mubr.f32.vlgmr.msra.gmra.mrb[0].mxu1 %v402_v60  ;;  %1538 = vmatmul.mubr.f32.vlgmr.msra.gmra.mrb[0].mxu0 %v400_v1  ;;  %v1659_v1 = vpack.c.bf16 %v468_v32, %v461_v29  ;;  %v496_v60 = vand.u32 4294901760, %v495_v4  ;;  %v1767_v29 = vpack.c.bf16 %v508_v31, %v501_v25  ;;  %v524_v32 = vand.u32 4294901760, %v523_v23 }
  0xac   : > { %1654 = vmatpush3.bf16.msra.mxu1 %v1651_v22  ;;  %1750 = vmatpush3.bf16.msra.mxu0 %v1747_v13  ;;  %v1663_v13 = vpack.c.bf16 %v482_v16, %v475_v36  ;;  %v502_v22 = vsub.f32 %v2713_v2, %v501_v25  ;;  %v531_v36 = vand.u32 4294901760, %v530_v8  ;;  %v1687_v4 = vpack.c.bf16 %v2602_v44, %v2600_v43 }
  0xad   : > { %1656 = vmatprep.subr.bf16.mxu1 %v1655_v55  ;;  %1752 = vmatprep.subr.bf16.mxu0 %v1751_v56  ;;  %v1667_v41 = vpack.c.bf16 %v496_v60, %v489_v45 }
  0xae   : > { %1426 = vmatprep.mubr.f32.mxu1 %v412_v9  ;;  %1540 = vmatprep.mubr.f32.mxu0 %v410_v15  ;;  %v2955_v15 = vand.u32 4294901760, %v2609_v47 }
  0xaf   : > { %1427 = vmatmul.mubr.f32.gmra.mrb[2].mxu1 %v422_v30  ;;  %1541 = vmatmul.mubr.f32.gmra.mrb[2].mxu0 %v420_v50  ;;  %v503_v50 = vand.u32 4294901760, %v502_v22  ;;  %v1771_v30 = vpack.c.bf16 %v522_v38, %v515_v59 }
  0xb0   : > { %1658 = vmatpush3.bf16.msra.mxu1 %v1655_v55  ;;  %1754 = vmatpush3.bf16.msra.mxu0 %v1751_v56  ;;  %v2752_v33 = vsub.f32 %v2609_v47, %v2955_v15  ;;  %v510_v56 = vand.u32 4294901760, %v509_v27 }
  0xb1   : > { %1660 = vmatprep.subr.bf16.mxu1 %v1659_v1  ;;  %1756 = vmatprep.subr.bf16.mxu0 %v1755_v17 }
  0xb2   : > { %1461 = vmatprep.mubr.f32.mxu1 %v2531_v18  ;;  %1575 = vmatprep.mubr.f32.mxu0 %v2531_v18  ;;  %v536_v47 = vand.u32 4294901760, %v2752_v33  ;;  %v1671_v55 = vpack.c.bf16 %v510_v56, %v503_v50 }
  0xb4   : > { %1662 = vmatpush3.bf16.msra.mxu1 %v1659_v1  ;;  %1758 = vmatpush3.bf16.msra.mxu0 %v1755_v17  ;;  %v537_v9 = vsub.f32 %v2752_v33, %v536_v47  ;;  %v1675_v17 = vpack.c.bf16 %v524_v32, %v517_v63  ;;  %v1775_v31 = vpack.c.bf16 %v536_v47, %v529_v28 }
  0xb5   : > { %1664 = vmatprep.subr.bf16.mxu1 %v1663_v13  ;;  %1760 = vmatprep.subr.bf16.mxu0 %v1759_v37  ;;  %v1683_v1 = vpack.c.bf16 %v2593_v40, %v2591_v39  ;;  %v1691_v39 = vpack.c.bf16 %v2649_v61, %v2640_v58  ;;  %v1699_v40 = vpack.c.bf16 %v2705_v49, %v2689_v20 }
  0xb6   : > { %v538_v16 = vand.u32 4294901760, %v537_v9 }
  0xb8   : > { %1666 = vmatpush3.bf16.msra.mxu1 %v1663_v13  ;;  %1762 = vmatpush3.bf16.msra.mxu0 %v1759_v37  ;;  %v1679_v25 = vpack.c.bf16 %v538_v16, %v531_v36 }
  0xb9   : > { %1668 = vmatprep.subr.bf16.mxu1 %v1667_v41  ;;  %1764 = vmatprep.subr.bf16.mxu0 %v1763_v34 }
  0xbc   : > { %1670 = vmatpush3.bf16.msra.mxu1 %v1667_v41  ;;  %1766 = vmatpush3.bf16.msra.mxu0 %v1763_v34 }
  0xbd   : > { %1672 = vmatprep.subr.bf16.mxu1 %v1671_v55  ;;  %1768 = vmatprep.subr.bf16.mxu0 %v1767_v29 }
  0xc0   : > { %1674 = vmatpush3.bf16.msra.mxu1 %v1671_v55  ;;  %1770 = vmatpush3.bf16.msra.mxu0 %v1767_v29 }
  0xc1   : > { %1676 = vmatprep.subr.bf16.mxu1 %v1675_v17  ;;  %1772 = vmatprep.subr.bf16.mxu0 %v1771_v30 }
  0xc4   : > { %1678 = vmatpush3.bf16.msra.mxu1 %v1675_v17  ;;  %1774 = vmatpush3.bf16.msra.mxu0 %v1771_v30 }
  0xc5   : > { %1680 = vmatprep.subr.bf16.mxu1 %v1679_v25  ;;  %1776 = vmatprep.subr.bf16.mxu0 %v1775_v31 }
  0xc8   : > { %1682 = vmatpush3.bf16.msra.mxu1 %v1679_v25  ;;  %1778 = vmatpush3.bf16.msra.mxu0 %v1775_v31 }
  0xc9   : > { %1684 = vmatprep.subr.bf16.mxu1 %v1683_v1  ;;  %1780 = vmatprep.subr.bf16.mxu0 %v2514_v11 }
  0xcb   : > { %1462 = vmatmul.mubr.f32.vlgmr.msra.gmra.mrb[0].mxu1 %v2598_v42  ;;  %1576 = vmatmul.mubr.f32.vlgmr.msra.gmra.mrb[0].mxu0 %v2598_v42 }
  0xcc   : > { %1686 = vmatpush3.bf16.msra.mxu1 %v1683_v1  ;;  %1782 = vmatpush3.bf16.msra.mxu0 %v2514_v11  ;;  %v1695_v11 = vpack.c.bf16 %v2674_v6, %v2669_v5  ;;  %v285_v6 = vld [vmem:[#allocation2 + $0x10] sm:$0xff] }
  0xcd   : > { %1688 = vmatprep.subr.bf16.mxu1 %v1687_v4  ;;  %1784 = vmatprep.subr.bf16.mxu0 %v2518_v14 }
  0xce   : > { %1464 = vmatprep.mubr.f32.mxu1 %v2651_v62  ;;  %1578 = vmatprep.mubr.f32.mxu0 %v2651_v62 }
  0xcf   : > { %1465 = vmatmul.mubr.f32.gmra.mrb[2].mxu1 %v2682_v12  ;;  %1579 = vmatmul.mubr.f32.gmra.mrb[2].mxu0 %v2682_v12 }
  0xd0   : > { %1690 = vmatpush3.bf16.msra.mxu1 %v1687_v4  ;;  %1786 = vmatpush3.bf16.msra.mxu0 %v2518_v14  ;;  %v1703_v14 = vpack.c.bf16 %v2723_v54, %v2713_v2  ;;  %v1265_v2 = vld [vmem:[%s273_s4] ss:$0 sm:$0xff] (!%p1264_p1) }
  0xd1   : > { %1692 = vmatprep.subr.bf16.mxu1 %v1691_v39  ;;  %1788 = vmatprep.subr.bf16.mxu0 %v2539_v19 }
  0xd2   : > { %1499 = vmatprep.mubr.f32.mxu1 %v2550_v24  ;;  %1613 = vmatprep.mubr.f32.mxu0 %v2531_v18  ;;  %v1707_v18 = vpack.c.bf16 %v2738_v10, %v2730_v51 }
  0xd4   : > { %1694 = vmatpush3.bf16.msra.mxu1 %v1691_v39  ;;  %1790 = vmatpush3.bf16.msra.mxu0 %v2539_v19  ;;  %v1711_v19 = vpack.c.bf16 %v2752_v33, %v2747_v52 }
  0xd5   : > { %1696 = vmatprep.subr.bf16.mxu1 %v1695_v11  ;;  %1792 = vmatprep.subr.bf16.mxu0 %v2561_v26 }
  0xd8   : > { %1698 = vmatpush3.bf16.msra.mxu1 %v1695_v11  ;;  %1794 = vmatpush3.bf16.msra.mxu0 %v2561_v26  ;;  %v284_v26 = vld [vmem:[#allocation2 + $0x8] sm:$0xff] }
  0xd9   : > { %1700 = vmatprep.subr.bf16.mxu1 %v1699_v40  ;;  %1796 = vmatprep.subr.bf16.mxu0 %v2582_v35 }
  0xdc   : > { %1702 = vmatpush3.bf16.msra.mxu1 %v1699_v40  ;;  %1798 = vmatpush3.bf16.msra.mxu0 %v2582_v35 }
  0xdd   : > { %1704 = vmatprep.subr.bf16.mxu1 %v1703_v14  ;;  %1800 = vmatprep.subr.bf16.mxu0 %v2617_v48 }
  0xe0   : > { %1706 = vmatpush3.bf16.msra.mxu1 %v1703_v14  ;;  %1802 = vmatpush3.bf16.msra.mxu0 %v2617_v48  ;;  %v283_v48 = vld [vmem:[#allocation2] sm:$0xff] }
  0xe1   : > { %1708 = vmatprep.subr.bf16.mxu1 %v1707_v18  ;;  %1804 = vmatprep.subr.bf16.mxu0 %v2635_v57 }
  0xe4   : > { %1710 = vmatpush3.bf16.msra.mxu1 %v1707_v18  ;;  %1806 = vmatpush3.bf16.msra.mxu0 %v2635_v57 }
  0xe5   : > { %1712 = vmatprep.subr.bf16.mxu1 %v1711_v19  ;;  %1808 = vmatprep.subr.bf16.mxu0 %v2658_v0 }
  0xe8   : > { %1714 = vmatpush3.bf16.msra.mxu1 %v1711_v19  ;;  %1810 = vmatpush3.bf16.msra.mxu0 %v2658_v0 }
  0xeb   : > { %1500 = vmatmul.mubr.f32.vlgmr.msra.gmra.mrb[0].mxu1 %v2624_v53  ;;  %1614 = vmatmul.mubr.f32.vlgmr.msra.gmra.mrb[0].mxu0 %v2598_v42  ;;  %v286_v42 = vld [vmem:[#allocation2 + $0x18] sm:$0xff] }
  0xec   : > { %1502 = vmatprep.mubr.f32.mxu1 %v2677_v7  ;;  %1616 = vmatprep.mubr.f32.mxu0 %v2651_v62 }
  0xef   : > { %1503 = vmatmul.mubr.f32.gmra.mrb[2].mxu1 %v2692_v21  ;;  %1617 = vmatmul.mubr.f32.gmra.mrb[2].mxu0 %v2682_v12 }
 0x1be   : > { %v1501_v24 = vpop.f32.mrb[0].mxu1  ;;  %v1615_v35 = vpop.f32.mrb[0].mxu0 }
 0x1bf   : > { %v1811_v43 = vadd.f32 %v1615_v35, %v1501_v24  ;;  %v697_v44 = vpop.f32.mrb[1].mxu1  ;;  %v1055_v51 = vpop.f32.mrb[1].mxu0 }
 0x1c0   : > { %v1812_v57 = vadd.f32 %v1055_v51, %v697_v44 }
 0x1c1   : > { %v1078_v58 = vadd.f32 %v1811_v43, %v284_v26 }
 0x1c2   : > { %v1077_v53 = vadd.f32 %v1812_v57, %v283_v48  ;;  %v1504_v61 = vpop.f32.mrb[2].mxu1  ;;  %v1618_v0 = vpop.f32.mrb[2].mxu0  ;;  %1088 = sbr.rel (%p1264_p1) target bundleno = 467 (0x1d3), region = 48 }
 0x1c3   : > { %1082 = vst [vmem:[#allocation2 + $0x8] sm:$0xff] %v1078_v58  ;;  %v1813_v5 = vadd.f32 %v1618_v0, %v1504_v61  ;;  %v711_v62 = vpop.f32.mrb[3].mxu1  ;;  %v1067_v7 = vpop.f32.mrb[3].mxu0 }
 0x1c4   : > { %1081 = vst [vmem:[#allocation2] sm:$0xff] %v1077_v53  ;;  %v1814_v12 = vadd.f32 %v1067_v7, %v711_v62 }
 0x1c5   : > { %v1080_v20 = vadd.f32 %v1813_v5, %v286_v42 }
 0x1c6   : > { %v1079_v21 = vadd.f32 %v1814_v12, %v285_v6 }
 0x1c7   : > { %1084 = vst [vmem:[#allocation2 + $0x18] sm:$0xff] %v1080_v20 }
 0x1c8   : > { %1083 = vst [vmem:[#allocation2 + $0x10] sm:$0xff] %v1079_v21 }
 0x1ca   : > { %v1090_v54 = vld [vmem:[#allocation2 + $0x8] sm:$0xff] }
 0x1cb   : > { %v1089_v49 = vld [vmem:[#allocation2] sm:$0xff]  ;;  %v1101_v37 = vadd.f32 %v1265_v2, %v1090_v54 }
 0x1cc   : > { %v1100_v10 = vadd.f32 %v1265_v2, %v1089_v49 }
 0x1cd   : > { %1105 = vst [vmem:[%s2501_s28 + $0x8] sm:$0xff] %v1101_v37 }
 0x1ce   : > { %v1092_v13 = vld [vmem:[#allocation2 + $0x18] sm:$0xff]  ;;  %1104 = vst [vmem:[%s2501_s28] sm:$0xff] %v1100_v10 }
 0x1cf   : > { %v1091_v45 = vld [vmem:[#allocation2 + $0x10] sm:$0xff]  ;;  %v1103_v27 = vadd.f32 %v1265_v2, %v1092_v13 }
 0x1d0   : > { %v1102_v22 = vadd.f32 %v1265_v2, %v1091_v45 }
 0x1d1   : > { %1107 = vst [vmem:[%s2501_s28 + $0x18] sm:$0xff] %v1103_v27 }
 0x1d2   : > { %1106 = vst [vmem:[%s2501_s28 + $0x10] sm:$0xff] %v1102_v22 }
 0x1d3 PF: > { %s1267_s18 = sshll.u32 %s2167_s22, 7  ;;  %s2957_s3 = sld [smem:[#allocation18_spill]] }
 0x1d4   : > { %s1124_s0 = sshll.u32 %s2501_s28, 4  ;;  %s2829_s11 = scalar_lea.sflag [#allocation5], %s266_s9  ;;  %s2825_s0 = int_to_ptr.vmem [resolvable:$true] %s1124_s0 }
 0x1d5   : > { %s2029_s10 = scalar_lea.vmem %s2825_s0, 512  ;;  %p2958_p4 = scmp.ne.s32.totalorder %s2944_s5, 0 }
 0x1d6   : > { %p2030_p0 = scmp.ne.s32.totalorder %s2825_s0, %s2029_s10  ;;  %s2187_s22 = smov [#allocation8]  }
 0x1d7   : > { %s2033_s4 = sshll.u32 %s2187_s22, 4  ;;  %s2034_s4 = int_to_ptr.vmem [resolvable:$false] %s2033_s4 }
 0x1d8   : > { %p2031_p5 = pnand %p2030_p0, %p2958_p4  ;;  %s2035_s6 = scalar_lea.vmem %s2034_s4, 1024 }
 0x1d9   : > { %s2822_s7 = scalar_lea.hbm %s2957_s3, %s1267_s18  ;;  %p2036_p11 = scmp.lt.s32.totalorder %s2825_s0, %s2034_s4 }
 0x1da   : > { %p2032_p12 = pneg %p2031_p5  ;;  %p2037_p3 = scmp.lt.s32.totalorder %s2035_s6, %s2029_s10 }
 0x1dc   : > { %p2038_p6 = por %p2037_p3, %p2036_p11 }
 0x1de   : > { %p2039_p9 = pnand %p2038_p6, %p2032_p12 }
 0x1e0   : > { %2042 = shalt.err (!%p2039_p9)
}
 0x1e1   : > { %s2043_s9 = scalar_lea.hbm %s2822_s7, 512  ;;  %s2047_s26 = scalar_lea.hbm %s2957_s3, 1024 }
 0x1e2   : > { %p2044_p2 = scmp.ne.s32.totalorder %s2822_s7, %s2043_s9  ;;  %p2048_p8 = scmp.lt.u32.totalorder %s2822_s7, %s2957_s3 }
 0x1e3   : > { %p2049_p10 = scmp.lt.u32.totalorder %s2047_s26, %s2043_s9  ;;  %p2051_p0 = scmp.lt.u32.totalorder %s2043_s9, %s2822_s7 }
 0x1e4   : > { %p2045_p13 = pnand %p2044_p2, %p2958_p4 }
 0x1e5   : > { %p2050_p1 = por %p2049_p10, %p2048_p8 }
 0x1e6   : > { %p2046_p7 = pneg %p2045_p13 }
 0x1e7   : > { %p2052_p5 = por %p2051_p0, %p2050_p1 }
 0x1e9   : > { %p2053_p12 = pnand %p2052_p5, %p2046_p7 }
 0x1eb   : > { %2056 = shalt.err (!%p2053_p12)
}
 0x1ec   : > { %s2188_s21 = smov 128   ;;  %s2189_s15 = smov 256  }
 0x1ed   : > { %s2190_s10 = smov 8  }
 0x1ee   : > { %1835 = dma.vmem_to_hbm [thread:$0]  (%p2958_p4), %s2825_s0, 512, %s2822_s7, %s2829_s11, %s2188_s21, %s2189_s15, %s2190_s10  }
 0x1ef PF: > { %p1849_p11 = scmp.ge.s32.totalorder %s2179_s25, 2  ;;  %s1139_s22 = sand.u32 1, %s2127_s12  }
 0x1f0   : > { %p2959_p3 = scmp.ne.s32.totalorder %s2945_s30, 0  ;;  %s1140_s4 = scalar_lea.sflag [#allocation5], %s1139_s22 }
 0x1f2   : > { %p1845_p6 = pnand %p1849_p11, %p2959_p3 }
 0x1f4   : > { %2122 = dma.done.wait (!%p1845_p6), %s1140_s4, 512  }
 0x1f5   : > { %2124 = vsyncadd (!%p1845_p6), %s1140_s4, 4294966784  ;;  %s22_s25 = sadd.s32 1, %s2179_s25   ;;  %s2961_s5 = sld [smem:[#allocation12_spill]] }
 0x1f6   : > { %p2858_p9 = scmp.ge.s32.totalorder %s22_s25, 6   ;;  %s2962_s20 = sld [smem:[#allocation15_spill]] }
 0x1f7   : > { %s2963_s30 = sld [smem:[#allocation14_spill]]  ;;  %s2964_s7 = sld [smem:[#allocation16_spill]] }
 0x1f8   : > { %s2965_s12 = smov %s2131_s13  ;;  %s2966_s13 = smov %s2135_s14 }
 0x1f9   : > { %s2967_s14 = smov %s2416_s29  ;;  %s2968_s15 = smov %s2143_s16 }
 0x1fa   : > { %s2969_s16 = smov %s2147_s17  ;;  %s2970_s17 = smov %s2419_s27 }
 0x1fb   : > { %s2971_s18 = smov %s2155_s19  ;;  %s2972_s19 = smov %s2961_s5 }
 0x1fc   : > { %s2973_s21 = smov %s2171_s23  ;;  %s2974_s22 = smov %s2175_s24 }
 0x1fd   : > { %s2975_s23 = smov %s2963_s30  ;;  %s2976_s24 = smov %s2964_s7 }
 0x1fe   :  { %21 = sbr.rel (!%p2858_p9) target bundleno = 15 (0xf), region = 101 }
 0x205   :  { %1145 = vsyncpa [#allocation4], 1 }
 0x206   :  { %1147 = vsyncpa [#allocation4 + $0x1], 1 }
 0x207   :  { %1148 = vsyncpa [#allocation7], 1 }
 0x208   :  { %1150 = vsyncpa [#allocation7 + $0x1], 1 }
 0x209   :  { %1151 = vsyncpa [#allocation5], 1 }
 0x20a   :  { %1153 = vsyncpa [#allocation5 + $0x1], 1 }

</bundles_post_ra>
